<compile_context>
chip_gen: v7x
topology: tpu7x:2x2x1
jax: 0.10.0
libtpu: 0.0.40
codegen_flags: <defaults>
</compile_context>

<pallas_src>
import functools

import jax
import jax.numpy as jnp
from jax.experimental import pallas as pl
from jax.experimental.pallas import tpu as pltpu

EPS = 1e-5  # nn.LayerNorm default


def _round_up(a, b):
    return ((a + b - 1) // b) * b


def _pick_n_tile(dim_p, max_n_tile):
    """Largest multiple of 128 <= max_n_tile that divides dim_p (dim_p % 128 == 0)."""
    if dim_p <= max_n_tile:
        return dim_p
    start = (max_n_tile // 128) * 128
    for cand in range(start, 127, -128):
        if dim_p % cand == 0:
            return cand
    return 128


def _prenorm_kernel(x_ref, gamma_ref, beta_ref, w_ref, b_ref, o_ref, normed_ref,
                    *, dim, dim_p):
    # x_ref:      (ROW_TILE, dim_p)
    # gamma/beta: (1, dim_p)
    # w_ref:      (dim_p, N_TILE)     b_ref: (1, N_TILE)
    # o_ref:      (ROW_TILE, N_TILE)
    # normed_ref: (ROW_TILE, dim_p) VMEM scratch in the input dtype.
    j = pl.program_id(1)

    # Compute LayerNorm once per row tile (the x block is constant across j).
    @pl.when(j == 0)
    def _():
        x = x_ref[...].astype(jnp.float32)
        inv_dim = 1.0 / dim
        mean = jnp.sum(x, axis=-1, keepdims=True) * inv_dim
        xc = x - mean
        if dim_p != dim:
            # Padded lanes are zero in x; mask them out of the variance and of
            # the normalized output (gamma/beta are also zero-padded there).
            col = jax.lax.broadcasted_iota(jnp.int32, x.shape, 1)
            xc = jnp.where(col < dim, xc, 0.0)
        var = jnp.sum(xc * xc, axis=-1, keepdims=True) * inv_dim
        inv = jax.lax.rsqrt(var + EPS)
        normed = xc * inv * gamma_ref[...].astype(jnp.float32) \
            + beta_ref[...].astype(jnp.float32)
        # Cast back to the input dtype so the MXU runs at its native (bf16) rate.
        normed_ref[...] = normed.astype(normed_ref.dtype)

    # fn(normed): Linear(dim, dim) column block on the MXU, f32 accumulation.
    y = jnp.dot(normed_ref[...], w_ref[...], preferred_element_type=jnp.float32)
    y = y + b_ref[...].astype(jnp.float32)
    o_ref[...] = y.astype(o_ref.dtype)


def prenorm(x, gamma, beta, w, b, *, row_tile=256, max_n_tile=1024):
    """x: (batch, seq, dim). Returns fn(LayerNorm(x)) with fn = x @ w + b."""
    batch, seq, dim = x.shape
    rows = batch * seq
    dtype = x.dtype

    # Lane-dense feature dimension (multiple of 128).
    dim_p = _round_up(dim, 128)

    # Row tile: multiple of 16 (covers f32 sublane=8 and bf16 sublane packing=16),
    # capped to the (rounded-up) number of rows so tiny inputs don't over-pad.
    base = 16
    eff_rt = min(row_tile, _round_up(rows, base))
    eff_rt = _round_up(eff_rt, base)
    rows_p = _round_up(rows, eff_rt)

    n_tile = _pick_n_tile(dim_p, max_n_tile)

    # Zero-pad everything (zero widths are no-ops).
    x2 = jnp.pad(x.reshape(rows, dim), ((0, rows_p - rows), (0, dim_p - dim)))
    gamma2 = jnp.pad(gamma.reshape(1, dim), ((0, 0), (0, dim_p - dim)))
    beta2 = jnp.pad(beta.reshape(1, dim), ((0, 0), (0, dim_p - dim)))
    w2 = jnp.pad(w, ((0, dim_p - dim), (0, dim_p - dim)))
    b2 = jnp.pad(b.reshape(1, dim), ((0, 0), (0, dim_p - dim)))

    grid = (rows_p // eff_rt, dim_p // n_tile)

    kernel = functools.partial(_prenorm_kernel, dim=dim, dim_p=dim_p)

    out = pl.pallas_call(
        kernel,
        out_shape=jax.ShapeDtypeStruct((rows_p, dim_p), dtype),
        grid_spec=pltpu.PrefetchScalarGridSpec(
            num_scalar_prefetch=0,
            grid=grid,
            in_specs=[
                pl.BlockSpec((eff_rt, dim_p), lambda i, j: (i, 0)),   # x rows (constant in j)
                pl.BlockSpec((1, dim_p), lambda i, j: (0, 0)),        # gamma
                pl.BlockSpec((1, dim_p), lambda i, j: (0, 0)),        # beta
                pl.BlockSpec((dim_p, n_tile), lambda i, j: (0, j)),   # fn weight column block
                pl.BlockSpec((1, n_tile), lambda i, j: (0, j)),       # fn bias block
            ],
            out_specs=pl.BlockSpec((eff_rt, n_tile), lambda i, j: (i, j)),
            scratch_shapes=[pltpu.VMEM((eff_rt, dim_p), dtype)],      # normalized activations
        ),
        compiler_params=pltpu.CompilerParams(
            dimension_semantics=("parallel", "arbitrary"),
        ),
    )(x2, gamma2, beta2, w2, b2)

    return out[:rows, :dim].reshape(batch, seq, dim)


def _reference(x, gamma, beta, w, b):
    xf = x.astype(jnp.float32)
    mean = jnp.mean(xf, axis=-1, keepdims=True)
    var = jnp.mean((xf - mean) ** 2, axis=-1, keepdims=True)
    xn = (xf - mean) * jax.lax.rsqrt(var + EPS)
    normed = xn * gamma + beta
    return jnp.einsum("bsd,de->bse", normed, w) + b


if __name__ == "__main__":
    batch, seq, dim = 2, 8, 32

    key = jax.random.PRNGKey(0)
    kx, kw, kb = jax.random.split(key, 3)

    x = jax.random.normal(kx, (batch, seq, dim), dtype=jnp.float32)

    # LayerNorm params: PyTorch default init (weight=1, bias=0), perturbed
    # deterministically so the affine part is exercised.
    gamma = jnp.ones((dim,), jnp.float32) + 0.01 * jnp.arange(dim, dtype=jnp.float32)
    beta = 0.001 * jnp.arange(dim, dtype=jnp.float32)

    # fn = Linear(dim, dim) with deterministic weights.
    w = jax.random.normal(kw, (dim, dim), dtype=jnp.float32) * 0.1
    b = jax.random.normal(kb, (dim,), dtype=jnp.float32) * 0.1

    out = prenorm(x, gamma, beta, w, b)
    out = jax.block_until_ready(out)

    ref = _reference(x, gamma, beta, w, b)
    assert out.shape == (batch, seq, dim)
    assert jnp.allclose(out, ref, atol=1e-4, rtol=1e-4), "mismatch vs reference"

    print("KERNEL_OK")
</pallas_src>

<mosaic_0001>
module attributes {stable_mosaic.version = 11 : i64} {
  func.func @_prenorm_kernel(%arg0: i32, %arg1: i32, %arg2: memref<16x128xf32, #tpu.memory_space<vmem>>, %arg3: memref<1x128xf32, #tpu.memory_space<vmem>>, %arg4: memref<1x128xf32, #tpu.memory_space<vmem>>, %arg5: memref<128x128xf32, #tpu.memory_space<vmem>>, %arg6: memref<1x128xf32, #tpu.memory_space<vmem>>, %arg7: memref<16x128xf32, #tpu.memory_space<vmem>>, %arg8: memref<16x128xf32, #tpu.memory_space<vmem>>) attributes {dimension_semantics = [#tpu.dimension_semantics<parallel>, #tpu.dimension_semantics<arbitrary>], iteration_bounds = array<i64: 1, 1>, scalar_prefetch = 0 : i64, scratch_operands = 1 : i64, tpu.core_type = #tpu.core_type<tc>, window_params = [{transform_indices = @transform_0, window_bounds = array<i64: 16, 128>}, {pipeline_mode = #tpu.pipeline_mode<synchronous>, transform_indices = @transform_1, window_bounds = array<i64: 1, 128>}, {pipeline_mode = #tpu.pipeline_mode<synchronous>, transform_indices = @transform_2, window_bounds = array<i64: 1, 128>}, {transform_indices = @transform_3, window_bounds = array<i64: 128, 128>}, {transform_indices = @transform_4, window_bounds = array<i64: 1, 128>}, {transform_indices = @transform_5, window_bounds = array<i64: 16, 128>}]} {
    %c0_i32 = arith.constant 0 : i32
    %0 = arith.cmpi eq, %arg1, %c0_i32 : i32
    %1 = arith.extui %0 : i1 to i32
    %c0_i32_0 = arith.constant 0 : i32
    %2 = arith.cmpi ne, %1, %c0_i32_0 : i32
    scf.if %2 {
      %c0_8 = arith.constant 0 : index
      %c0_9 = arith.constant 0 : index
      %10 = vector.load %arg2[%c0_8, %c0_9] : memref<16x128xf32, #tpu.memory_space<vmem>>, vector<16x128xf32>
      %cst_10 = arith.constant dense<0.000000e+00> : vector<16xf32>
      %11 = vector.multi_reduction <add>, %10, %cst_10 [1] : vector<16x128xf32> to vector<16xf32>
      %12 = vector.shape_cast %11 : vector<16xf32> to vector<16x1xf32>
      %cst_11 = arith.constant 3.125000e-02 : f32
      %13 = vector.broadcast %cst_11 : f32 to vector<16x1xf32>
      %14 = arith.mulf %12, %13 : vector<16x1xf32>
      %15 = vector.broadcast %14 : vector<16x1xf32> to vector<16x128xf32>
      %16 = arith.subf %10, %15 : vector<16x128xf32>
      %17 = tpu.iota {dimensions = array<i32: 1>} : vector<16x128xi32>
      %c32_i32 = arith.constant 32 : i32
      %18 = vector.broadcast %c32_i32 : i32 to vector<16x128xi32>
      %19 = arith.cmpi slt, %17, %18 : vector<16x128xi32>
      %cst_12 = arith.constant 0.000000e+00 : f32
      %20 = vector.broadcast %cst_12 : f32 to vector<16x128xf32>
      %21 = arith.select %19, %16, %20 : vector<16x128xi1>, vector<16x128xf32>
      %22 = arith.mulf %21, %21 : vector<16x128xf32>
      %cst_13 = arith.constant dense<0.000000e+00> : vector<16xf32>
      %23 = vector.multi_reduction <add>, %22, %cst_13 [1] : vector<16x128xf32> to vector<16xf32>
      %24 = vector.shape_cast %23 : vector<16xf32> to vector<16x1xf32>
      %cst_14 = arith.constant 3.125000e-02 : f32
      %25 = vector.broadcast %cst_14 : f32 to vector<16x1xf32>
      %26 = arith.mulf %24, %25 : vector<16x1xf32>
      %cst_15 = arith.constant 9.99999974E-6 : f32
      %27 = vector.broadcast %cst_15 : f32 to vector<16x1xf32>
      %28 = arith.addf %26, %27 : vector<16x1xf32>
      %29 = math.rsqrt %28 : vector<16x1xf32>
      %30 = vector.broadcast %29 : vector<16x1xf32> to vector<16x128xf32>
      %31 = arith.mulf %21, %30 : vector<16x128xf32>
      %c0_16 = arith.constant 0 : index
      %c0_17 = arith.constant 0 : index
      %32 = vector.load %arg3[%c0_16, %c0_17] : memref<1x128xf32, #tpu.memory_space<vmem>>, vector<1x128xf32>
      %33 = vector.broadcast %32 : vector<1x128xf32> to vector<16x128xf32>
      %34 = arith.mulf %31, %33 : vector<16x128xf32>
      %c0_18 = arith.constant 0 : index
      %c0_19 = arith.constant 0 : index
      %35 = vector.load %arg4[%c0_18, %c0_19] : memref<1x128xf32, #tpu.memory_space<vmem>>, vector<1x128xf32>
      %36 = vector.broadcast %35 : vector<1x128xf32> to vector<16x128xf32>
      %37 = arith.addf %34, %36 : vector<16x128xf32>
      %c0_20 = arith.constant 0 : index
      %c0_21 = arith.constant 0 : index
      %38 = vector.load %arg8[%c0_20, %c0_21] : memref<16x128xf32, #tpu.memory_space<vmem>>, vector<16x128xf32>
      tpu.vector_store %arg8[%c0_20, %c0_21], %37 {strides = array<i32>} : memref<16x128xf32, #tpu.memory_space<vmem>>, vector<16x128xf32>,
    } else {
    }
    %c0 = arith.constant 0 : index
    %c0_1 = arith.constant 0 : index
    %3 = vector.load %arg8[%c0, %c0_1] : memref<16x128xf32, #tpu.memory_space<vmem>>, vector<16x128xf32>
    %c0_2 = arith.constant 0 : index
    %c0_3 = arith.constant 0 : index
    %4 = vector.load %arg5[%c0_2, %c0_3] : memref<128x128xf32, #tpu.memory_space<vmem>>, vector<128x128xf32>
    %cst = arith.constant dense<0.000000e+00> : vector<16x128xf32>
    %5 = tpu.matmul %3, %4, %cst {dimension_numbers = #tpu.dot_dimension_numbers<[1], [0], [0], [1], [0, 0, 1, 1], [], []>} : vector<16x128xf32>, vector<128x128xf32>, vector<16x128xf32> -> vector<16x128xf32>
    %c0_4 = arith.constant 0 : index
    %c0_5 = arith.constant 0 : index
    %6 = vector.load %arg6[%c0_4, %c0_5] : memref<1x128xf32, #tpu.memory_space<vmem>>, vector<1x128xf32>
    %7 = vector.broadcast %6 : vector<1x128xf32> to vector<16x128xf32>
    %8 = arith.addf %5, %7 : vector<16x128xf32>
    %c0_6 = arith.constant 0 : index
    %c0_7 = arith.constant 0 : index
    %9 = vector.load %arg7[%c0_6, %c0_7] : memref<16x128xf32, #tpu.memory_space<vmem>>, vector<16x128xf32>
    tpu.vector_store %arg7[%c0_6, %c0_7], %8 {strides = array<i32>} : memref<16x128xf32, #tpu.memory_space<vmem>>, vector<16x128xf32>,
    return
  }
  func.func @transform_0(%arg0: i32, %arg1: i32) -> (i32, i32) {
    %c0_i32 = arith.constant 0 : i32
    %c0_i32_0 = arith.constant 0 : i32
    return %arg0, %c0_i32 : i32, i32
  }
  func.func @transform_1(%arg0: i32, %arg1: i32) -> (i32, i32) {
    %c0_i32 = arith.constant 0 : i32
    %c0_i32_0 = arith.constant 0 : i32
    %c0_i32_1 = arith.constant 0 : i32
    return %c0_i32, %c0_i32_0 : i32, i32
  }
  func.func @transform_2(%arg0: i32, %arg1: i32) -> (i32, i32) {
    %c0_i32 = arith.constant 0 : i32
    %c0_i32_0 = arith.constant 0 : i32
    %c0_i32_1 = arith.constant 0 : i32
    return %c0_i32, %c0_i32_0 : i32, i32
  }
  func.func @transform_3(%arg0: i32, %arg1: i32) -> (i32, i32) {
    %c0_i32 = arith.constant 0 : i32
    %c0_i32_0 = arith.constant 0 : i32
    return %c0_i32, %arg1 : i32, i32
  }
  func.func @transform_4(%arg0: i32, %arg1: i32) -> (i32, i32) {
    %c0_i32 = arith.constant 0 : i32
    %c0_i32_0 = arith.constant 0 : i32
    return %c0_i32, %arg1 : i32, i32
  }
  func.func @transform_5(%arg0: i32, %arg1: i32) -> (i32, i32) {
    %c0_i32 = arith.constant 0 : i32
    return %arg0, %arg1 : i32, i32
  }
}

</mosaic_0001>

<bundles_post_ra>
// kernel: tpu_custom_call.1
= control target key start
LH: loop header
LB: loop body
LE: loop exit
PB: predicated region body
PF: predicated region fallthrough
CT: control target
= control target key end

     0   :  { %10 = vsyncpa [#allocation4], 0  ;;  %s480_s0 = inlined_call_operand.hbm [shape: f32[16,128], index: 0, kind: input, shape index: {}]   ;;  %s481_s1 = inlined_call_operand.vmem [shape: f32[1,128], index: 1, kind: input, shape index: {}]   ;;  %s482_s2 = inlined_call_operand.vmem [shape: f32[1,128], index: 2, kind: input, shape index: {}]   ;;  %s483_s3 = inlined_call_operand.hbm [shape: f32[128,128], index: 3, kind: input, shape index: {}]   ;;  %s484_s4 = inlined_call_operand.vmem [shape: f32[1,128], index: 4, kind: input, shape index: {}]   ;;  %s485_s5 = inlined_call_operand.hbm [shape: f32[16,128], index: 5, kind: output, shape index: {}]  }
   0x1   :  { %11 = vsyncpa [#allocation7], 0 }
   0x2   :  { %12 = vsyncpa [#allocation5], 0  ;;  %s391_s18 = smov [#allocation3]   ;;  %s319_s22 = scalar_lea.hbm %s480_s0, 256 }
   0x3   :  { %s18_s19 = sshll.u32 %s391_s18, 4  ;;  %p320_p0 = scmp.ne.s32.totalorder %s480_s0, %s319_s22  ;;  %s19_s19 = int_to_ptr.vmem [resolvable:$true] %s18_s19 }
   0x4   :  { %p323_p1 = scmp.lt.u32.totalorder %s319_s22, %s480_s0 }
   0x6   :  { %p325_p2 = pnand %p323_p1, %p320_p0 }
   0x8   :  { %328 = shalt.err (!%p325_p2)
}
   0x9   :  { %s329_s27 = scalar_lea.vmem %s19_s19, 256  ;;  %p334_p4 = scmp.lt.s32.totalorder %s19_s19, %s19_s19 }
   0xa   :  { %p330_p3 = scmp.ne.s32.totalorder %s19_s19, %s329_s27  ;;  %p335_p5 = scmp.lt.s32.totalorder %s329_s27, %s329_s27 }
   0xc   :  { %p336_p6 = por %p335_p5, %p334_p4 }
   0xe   :  { %p337_p7 = pnand %p336_p6, %p330_p3 }
  0x10   :  { %340 = shalt.err (!%p337_p7)
}
  0x11   :  { %s392_s28 = smov 128   ;;  %s393_s29 = smov 8  }
  0x12   :  { %24 = dma.hbm_to_vmem [thread:$0]  %s480_s0, 256, %s19_s19, [#allocation4], %s392_s28, %s392_s28, %s393_s29  }
  0x13   :  { %s394_s7 = smov [#allocation6]   ;;  %s341_s11 = scalar_lea.hbm %s483_s3, 2048 }
  0x14   :  { %s34_s8 = sshll.u32 %s394_s7, 4  ;;  %p342_p8 = scmp.ne.s32.totalorder %s483_s3, %s341_s11  ;;  %s35_s8 = int_to_ptr.vmem [resolvable:$true] %s34_s8 }
  0x15   :  { %p345_p9 = scmp.lt.u32.totalorder %s341_s11, %s483_s3 }
  0x17   :  { %p347_p10 = pnand %p345_p9, %p342_p8 }
  0x19   :  { %350 = shalt.err (!%p347_p10)
}
  0x1a   :  { %s351_s16 = scalar_lea.vmem %s35_s8, 2048  ;;  %p356_p12 = scmp.lt.s32.totalorder %s35_s8, %s35_s8 }
  0x1b   :  { %p352_p11 = scmp.ne.s32.totalorder %s35_s8, %s351_s16  ;;  %p357_p13 = scmp.lt.s32.totalorder %s351_s16, %s351_s16 }
  0x1d   :  { %p358_p0 = por %p357_p13, %p356_p12 }
  0x1f   :  { %p359_p1 = pnand %p358_p0, %p352_p11 }
  0x21   :  { %362 = shalt.err (!%p359_p1)
}
  0x22   :  { %40 = dma.hbm_to_vmem [thread:$0]  %s483_s3, 2048, %s35_s8, [#allocation7], %s392_s28, %s392_s28, %s393_s29  }
  0x23   :  { %385 = dma.done.wait [#allocation4], 256  }
  0x24   :  { %386 = vsyncadd [#allocation4], 4294967040 }
  0x25   :  { %387 = dma.done.wait [#allocation7], 2048  }
  0x26   :  { %388 = vsyncadd [#allocation7], 4294965248  ;;  %v53_v0 = vld [vmem:[#allocation3] sm:$0xff]  ;;  %v54_v1 = vld [vmem:[#allocation3 + $0x8] sm:$0xff]  ;;  %v63_v8 = vlaneseq  ;;  %s395_s23 = smov [#allocation8]  }
  0x27   :  { %55 = vadd.xlane.f32.xlu0 %v53_v0  ;;  %v104_v2 = vld [vmem:[#allocation6] sm:$0xff]  ;;  %v105_v3 = vld [vmem:[#allocation6 + $0x8] sm:$0xff]  ;;  %v106_v4 = vld [vmem:[#allocation6 + $0x10] sm:$0xff]  ;;  %s209_s24 = sshll.u32 %s395_s23, 4  ;;  %s210_s24 = int_to_ptr.vmem [resolvable:$true] %s209_s24 }
  0x28   :  { %v278_v5 = vpack.c.bf16 %v105_v3, %v104_v2  ;;  %v107_v6 = vld [vmem:[#allocation6 + $0x18] sm:$0xff]  ;;  %v64_v9 = vand.u32 127, %v63_v8  ;;  %v108_v20 = vld [vmem:[#allocation6 + $0x20] sm:$0xff]  ;;  %v109_v21 = vld [vmem:[#allocation6 + $0x28] sm:$0xff]  ;;  %p368_p3 = scmp.lt.s32.totalorder %s210_s24, %s210_s24 }
  0x29   :  { %v282_v7 = vpack.c.bf16 %v107_v6, %v106_v4  ;;  %v286_v22 = vpack.c.bf16 %v109_v21, %v108_v20  ;;  %v110_v23 = vld [vmem:[#allocation6 + $0x30] sm:$0xff]  ;;  %v111_v24 = vld [vmem:[#allocation6 + $0x38] sm:$0xff]  ;;  %v112_v26 = vld [vmem:[#allocation6 + $0x40] sm:$0xff] }
  0x2a   :  { %279 = vmatprep.subr.bf16.mxu0 %v278_v5  ;;  %vm65_vm0 = vcmp.lt.s32.totalorder %v64_v9, 32  ;;  %v290_v25 = vpack.c.bf16 %v111_v24, %v110_v23  ;;  %v113_v27 = vld [vmem:[#allocation6 + $0x48] sm:$0xff]  ;;  %v114_v29 = vld [vmem:[#allocation6 + $0x50] sm:$0xff]  ;;  %v115_v30 = vld [vmem:[#allocation6 + $0x58] sm:$0xff] }
  0x2b   :  { %57 = vadd.xlane.f32.xlu0 %v54_v1  ;;  %281 = vmatpush3.bf16.msra.mxu0 %v278_v5  ;;  %v294_v28 = vpack.c.bf16 %v113_v27, %v112_v26  ;;  %v116_v31 = vld [vmem:[#allocation6 + $0x60] sm:$0xff]  ;;  %v298_v32 = vpack.c.bf16 %v115_v30, %v114_v29  ;;  %v117_v33 = vld [vmem:[#allocation6 + $0x68] sm:$0xff]  ;;  %v118_v35 = vld [vmem:[#allocation6 + $0x70] sm:$0xff] }
  0x2c   :  { %283 = vmatprep.subr.bf16.mxu0 %v282_v7  ;;  %v302_v34 = vpack.c.bf16 %v117_v33, %v116_v31  ;;  %v119_v36 = vld [vmem:[#allocation6 + $0x78] sm:$0xff]  ;;  %v222_v45 = vld [vmem:[%s481_s1] ss:$0 sm:$0xff]  ;;  %s363_s1 = scalar_lea.vmem %s210_s24, 256 }
  0x2d   :  { %v306_v37 = vpack.c.bf16 %v119_v36, %v118_v35  ;;  %v223_v47 = vld [vmem:[%s482_s2] ss:$0 sm:$0xff]  ;;  %p364_p2 = scmp.ne.s32.totalorder %s210_s24, %s363_s1  ;;  %p369_p4 = scmp.lt.s32.totalorder %s363_s1, %s363_s1 }
  0x2e   :  { %v224_v54 = vld [vmem:[%s484_s4] ss:$0 sm:$0xff] }
  0x2f   :  { %285 = vmatpush3.bf16.msra.mxu0 %v282_v7  ;;  %p370_p5 = por %p369_p4, %p368_p3 }
  0x30   :  { %287 = vmatprep.subr.bf16.mxu0 %v286_v22 }
  0x31   :  { %p371_p6 = pnand %p370_p5, %p364_p2 }
  0x33   :  { %289 = vmatpush3.bf16.msra.mxu0 %v286_v22 }
  0x34   :  { %291 = vmatprep.subr.bf16.mxu0 %v290_v25 }
  0x37   :  { %293 = vmatpush3.bf16.msra.mxu0 %v290_v25 }
  0x38   :  { %295 = vmatprep.subr.bf16.mxu0 %v294_v28 }
  0x3b   :  { %297 = vmatpush3.bf16.msra.mxu0 %v294_v28 }
  0x3c   :  { %299 = vmatprep.subr.bf16.mxu0 %v298_v32 }
  0x3f   :  { %301 = vmatpush3.bf16.msra.mxu0 %v298_v32 }
  0x40   :  { %303 = vmatprep.subr.bf16.mxu0 %v302_v34 }
  0x43   :  { %305 = vmatpush3.bf16.msra.mxu0 %v302_v34 }
  0x44   :  { %307 = vmatprep.subr.bf16.mxu0 %v306_v37 }
  0x47   :  { %309 = vmatpush3.bf16.msra.mxu0 %v306_v37 }
  0xb4   :  { %v56_v10 = vpop.xlane.xlu0 %55 }
  0xb5   :  { %v59_v11 = vmul.f32 0.03125, %v56_v10 }
  0xb7   :  { %v61_v12 = vsub.f32 %v53_v0, %v59_v11 }
  0xb8   :  { %v58_v13 = vpop.xlane.xlu0 %57 }
  0xb9   :  { %v60_v14 = vmul.f32 0.03125, %v58_v13  ;;  %v66_v15 = vsel %vm65_vm0, %v61_v12, 0.0 }
  0xba   :  { %v68_v16 = vmul.f32 %v66_v15, %v66_v15 }
  0xbb   :  { %v62_v17 = vsub.f32 %v54_v1, %v60_v14 }
  0xbc   :  { %70 = vadd.xlane.f32.xlu1 %v68_v16 }
  0xbd   :  { %v67_v18 = vsel %vm65_vm0, %v62_v17, 0.0 }
  0xbe   :  { %v69_v19 = vmul.f32 %v67_v18, %v67_v18 }
  0xc0   :  { %72 = vadd.xlane.f32.xlu1 %v69_v19 }
 0x149   :  { %v71_v38 = vpop.xlane.xlu1 %70 }
 0x14a   :  { %v74_v39 = vmul.f32 0.03125, %v71_v38 }
 0x14c   :  { %v76_v40 = vadd.f32 1e-05, %v74_v39 }
 0x14d   :  { %v73_v41 = vpop.xlane.xlu1 %72 }
 0x14e   :  { %315 = vrsqrt.f32 %v76_v40  ;;  %v75_v42 = vmul.f32 0.03125, %v73_v41 }
 0x150   :  { %v77_v43 = vadd.f32 1e-05, %v75_v42 }
 0x152   :  { %317 = vrsqrt.f32 %v77_v43 }
 0x158   :  { %v316_v44 = vpop.eup %315 }
 0x159   :  { %v80_v46 = vmul.f32 %v316_v44, %v66_v15 }
 0x15b   :  { %v89_v48 = vmul.f32 %v222_v45, %v80_v46 }
 0x15c   :  { %v318_v49 = vpop.eup %317 }
 0x15d   :  { %v81_v50 = vmul.f32 %v318_v49, %v67_v18  ;;  %v98_v51 = vadd.f32 %v223_v47, %v89_v48 }
 0x15f   :  { %v90_v52 = vmul.f32 %v222_v45, %v81_v50  ;;  %275 = vmatprep.mubr.f32.mxu0 %v98_v51 }
 0x161   :  { %v99_v53 = vadd.f32 %v223_v47, %v90_v52 }
 0x163   :  { %276 = vmatmul.mubr.f32.vlgmr.msra.gmra.mrb[0].mxu0 %v99_v53 }
 0x236   :  { %v277_v55 = vpop.f32.mrb[0].mxu0 }
 0x237   :  { %v199_v56 = vadd.f32 %v277_v55, %v224_v54  ;;  %v193_v57 = vpop.f32.mrb[1].mxu0 }
 0x238   :  { %v194_v58 = vadd.f32 %v224_v54, %v193_v57 }
 0x239   :  { %203 = vst [vmem:[#allocation8 + $0x8] sm:$0xff] %v199_v56 }
 0x23a   :  { %202 = vst [vmem:[#allocation8] sm:$0xff] %v194_v58 }
 0x23b   :  { %374 = shalt.err (!%p371_p6)
}
 0x23c   :  { %s375_s4 = scalar_lea.hbm %s485_s5, 256 }
 0x23d   :  { %p376_p7 = scmp.ne.s32.totalorder %s485_s5, %s375_s4  ;;  %p379_p8 = scmp.lt.u32.totalorder %s375_s4, %s485_s5 }
 0x23f   :  { %p381_p9 = pnand %p379_p8, %p376_p7 }
 0x241   :  { %384 = shalt.err (!%p381_p9)
}
 0x242   :  { %215 = dma.vmem_to_hbm [thread:$0]  %s210_s24, 256, %s485_s5, [#allocation5], %s392_s28, %s392_s28, %s393_s29  }
 0x243   :  { %389 = dma.done.wait [#allocation5], 256  }
 0x244   :  { %390 = vsyncadd [#allocation5], 4294967040 }
 0x245   :  { %219 = vsyncpa [#allocation4], 1 }
 0x246   :  { %220 = vsyncpa [#allocation7], 1 }
 0x247   :  { %221 = vsyncpa [#allocation5], 1 }

</bundles_post_ra>
